<compile_context>
chip_gen: v5e
topology: v5e:2x2
jax: 0.10.0
libtpu: 0.0.40
codegen_flags: <defaults>
</compile_context>

<pallas_src>
import functools
import math

import jax
import jax.numpy as jnp
from jax.experimental import pallas as pl
from jax.experimental.pallas import tpu as pltpu


def _round_up(x, m):
    return ((x + m - 1) // m) * m


def _pick_tm(batch):
    """Row-tile size: fill the MXU when possible, keep >=2 row tiles for v7x."""
    bp = _round_up(batch, 8)
    if bp >= 512:
        return 256          # fills the 256-row MXU (v6e/v7x), still >=2 tiles
    if bp >= 256:
        return 128
    if bp >= 16:
        return _round_up(bp // 2, 8)   # >=2 row tiles so both TCs get work
    return bp


# ----------------------------------------------------------------------------
# Weight packing (do this once per step / once for inference)
# ----------------------------------------------------------------------------
def pack_arc_margin_weight(weight, *, sub=1):
    """(out_features*sub, D) f32 -> (sub, Cpad, Dpad) bf16, L2-normalized rows."""
    CS, D = weight.shape
    assert CS % sub == 0
    C = CS // sub
    Dpad = _round_up(D, 128)
    Cpad = _round_up(C, 128)
    w = weight.astype(jnp.float32)
    w = w / jnp.maximum(jnp.linalg.norm(w, axis=-1, keepdims=True), 1e-12)
    # class c, sub-center k  <-  row c*sub + k   (matches cosine.view(-1, C, sub))
    w3 = w.reshape(C, sub, D).transpose(1, 0, 2)                 # (sub, C, D)
    return jnp.pad(w3, ((0, 0), (0, Cpad - C), (0, Dpad - D))).astype(jnp.bfloat16)


# ----------------------------------------------------------------------------
# Fused ArcMarginProduct kernel
# ----------------------------------------------------------------------------
def _arc_margin_kernel(x_ref, w_ref, lab_ref, o_ref, xn_ref, *,
                       sub, cos_m_s, sin_m_s, th, mm_s, s, tn, easy_margin):
    j = pl.program_id(1)

    # Normalize the x rows once per row-tile; the class axis (j) is the inner,
    # sequential ("arbitrary") axis, so the cached bf16 copy is reused across
    # all class tiles of this row tile.
    @pl.when(j == 0)
    def _():
        x = x_ref[...].astype(jnp.float32)                       # (tm, Dpad)
        x_ss = jnp.sum(x * x, axis=-1, keepdims=True)
        xn = x * jax.lax.rsqrt(jnp.maximum(x_ss, 1e-24))         # x / max(||x||,1e-12)
        xn_ref[...] = xn.astype(jnp.bfloat16)

    xb = xn_ref[...]                                             # (tm, Dpad) bf16

    # cosine = x_n @ W_n^T (weights pre-normalized bf16), max over `sub` centers.
    cos = None
    for k in range(sub):                                         # static unroll
        c = jax.lax.dot_general(                                 # (tm, tn) A @ B^T
            xb, w_ref[k],
            dimension_numbers=(((1,), (1,)), ((), ())),
            preferred_element_type=jnp.float32)                  # f32 accumulation
        cos = c if cos is None else jnp.maximum(cos, c)

    # --- ArcFace margin, `s` folded into the constants (f32 epilogue) ---
    # clamp 1-cos^2 at 0 to avoid NaN from bf16 rounding (|cos| can hit 1+eps)
    sine = jnp.sqrt(jnp.maximum(1.0 - cos * cos, 0.0))
    cos_s = cos * s
    phi_s = cos * cos_m_s - sine * sin_m_s                       # == phi * s
    if easy_margin:
        phi_s = jnp.where(cos > 0.0, phi_s, cos_s)
    else:
        phi_s = jnp.where(cos - th > 0.0, phi_s, cos_s - mm_s)   # (cos - mm) * s

    # one_hot(label) selection without a scatter: loop-invariant lane iota vs
    # the label shifted by this class tile's base column.
    col = jax.lax.broadcasted_iota(jnp.int32, cos.shape, 1)
    onehot = col == (lab_ref[...] - j * tn)                      # (tm,1) broadcast
    o_ref[...] = jnp.where(onehot, phi_s, cos_s)


# ----------------------------------------------------------------------------
# Wrappers
# ----------------------------------------------------------------------------
def arc_margin_product_packed(x, label, w_packed, *, out_features,
                              s=32.0, m=0.5, sub=1, easy_margin=False):
    """Forward with a pre-packed weight (see pack_arc_margin_weight)."""
    B, D = x.shape
    subw, Cpad, Dpad = w_packed.shape
    assert subw == sub and Dpad == _round_up(D, 128) and Cpad >= out_features
    C = out_features

    tm = _pick_tm(B)
    Mpad = _round_up(B, tm)
    tn = 256 if Cpad % 256 == 0 else 128
    assert Mpad % tm == 0 and Cpad % tn == 0

    # Single-shot padding; padded rows/cols are sliced away at the end.
    xp = jnp.pad(x.astype(jnp.float32), ((0, Mpad - B), (0, Dpad - D)))
    lab = jnp.pad(label.astype(jnp.int32), (0, Mpad - B)).reshape(Mpad, 1)

    kernel = functools.partial(
        _arc_margin_kernel,
        sub=sub,
        cos_m_s=math.cos(m) * float(s), sin_m_s=math.sin(m) * float(s),
        th=math.cos(math.pi - m), mm_s=math.sin(math.pi - m) * m * float(s),
        s=float(s), tn=tn, easy_margin=bool(easy_margin))

    # Double-buffered VMEM footprint -> explicit budget (matters on v7x: 64 MiB).
    vmem_bytes = (2 * tm * Dpad * 4            # x tiles (f32)
                  + 2 * sub * tn * Dpad * 2    # weight tiles (bf16)
                  + 2 * tm * tn * 4            # output tiles (f32)
                  + tm * Dpad * 2              # normalized-x scratch (bf16)
                  + 2 * tm * 4)                # label tiles
    vmem_limit = int(min(max(32 << 20, 2 * vmem_bytes), 64 << 20))

    out = pl.pallas_call(
        kernel,
        out_shape=jax.ShapeDtypeStruct((Mpad, Cpad), jnp.float32),
        grid=(Mpad // tm, Cpad // tn),
        in_specs=[
            pl.BlockSpec((tm, Dpad), lambda i, j: (i, 0)),
            pl.BlockSpec((sub, tn, Dpad), lambda i, j: (0, j, 0)),
            pl.BlockSpec((tm, 1), lambda i, j: (i, 0)),
        ],
        out_specs=pl.BlockSpec((tm, tn), lambda i, j: (i, j)),
        scratch_shapes=[pltpu.VMEM((tm, Dpad), jnp.bfloat16)],
        compiler_params=pltpu.CompilerParams(
            dimension_semantics=("parallel", "arbitrary"),
            vmem_limit_bytes=vmem_limit),
    )(xp, w_packed, lab)
    return out[:B, :C]


def arc_margin_product(x, label, weight, *, s=32.0, m=0.5, sub=1,
                       easy_margin=False):
    """ArcMarginProduct.forward(x, label) with a raw (C*sub, D) weight.

    Convenience path: packs (normalize + reshape + pad + bf16) the weight on
    every call.  For repeated use, call pack_arc_margin_weight() once and use
    arc_margin_product_packed().
    """
    C = weight.shape[0] // sub
    w_packed = pack_arc_margin_weight(weight, sub=sub)
    return arc_margin_product_packed(x, label, w_packed, out_features=C,
                                     s=s, m=m, sub=sub, easy_margin=easy_margin)


# ----------------------------------------------------------------------------
# Pure-JAX reference (mirrors the PyTorch module) for a correctness check
# ----------------------------------------------------------------------------
def arc_margin_reference(x, label, weight, *, s=32.0, m=0.5, sub=1,
                         easy_margin=False):
    xn = x / jnp.maximum(jnp.linalg.norm(x, axis=-1, keepdims=True), 1e-12)
    wn = weight / jnp.maximum(
        jnp.linalg.norm(weight, axis=-1, keepdims=True), 1e-12)
    cosine = xn @ wn.T                                           # (B, C*sub)
    C = weight.shape[0] // sub
    if sub > 1:
        cosine = jnp.max(cosine.reshape(-1, C, sub), axis=2)
    sine = jnp.sqrt(jnp.clip(1.0 - cosine * cosine, 0.0, None))
    phi = cosine * math.cos(m) - sine * math.sin(m)
    if easy_margin:
        phi = jnp.where(cosine > 0.0, phi, cosine)
    else:
        phi = jnp.where(cosine - math.cos(math.pi - m) > 0.0, phi,
                        cosine - math.sin(math.pi - m) * m)
    one_hot = jax.nn.one_hot(label, C, dtype=cosine.dtype)
    return (one_hot * phi + (1.0 - one_hot) * cosine) * s


# ----------------------------------------------------------------------------
if __name__ == "__main__":
    key = jax.random.PRNGKey(0)
    kx, kw, kl, kw2, kl2 = jax.random.split(key, 5)

    # Module defaults: in_features=128, out_features=200, s=32, m=0.5, sub=1.
    B, D, C = 4, 128, 200
    bound = math.sqrt(6.0 / (C + D))                             # xavier_uniform_
    x = jax.random.normal(kx, (B, D), jnp.float32)
    weight = jax.random.uniform(kw, (C, D), jnp.float32, -bound, bound)
    label = jax.random.randint(kl, (B,), 0, C, dtype=jnp.int32)

    # Packed path: weight repack hoisted out of the per-call hot path.
    w_packed = jax.block_until_ready(pack_arc_margin_weight(weight, sub=1))
    fwd = jax.jit(functools.partial(arc_margin_product_packed, out_features=C,
                                    s=32.0, m=0.5, sub=1, easy_margin=False))
    out = fwd(x, label, w_packed)
    jax.block_until_ready(out)
    assert out.shape == (B, C), out.shape
    assert bool(jnp.all(jnp.isfinite(out)))
    ref = arc_margin_reference(x, label, weight, s=32.0, m=0.5, sub=1,
                               easy_margin=False)
    err = float(jnp.max(jnp.abs(out - ref)))
    assert err < 0.25, f"max |diff| = {err}"                     # bf16 MXU tolerance

    # sub > 1 path (max over sub-centers) through the convenience wrapper.
    C2, SUB = 100, 2
    w2 = jax.random.uniform(kw2, (C2 * SUB, D), jnp.float32, -bound, bound)
    lab2 = jax.random.randint(kl2, (B,), 0, C2, dtype=jnp.int32)
    out2 = jax.jit(functools.partial(arc_margin_product, sub=SUB))(x, lab2, w2)
    jax.block_until_ready(out2)
    assert out2.shape == (B, C2), out2.shape
    ref2 = arc_margin_reference(x, lab2, w2, sub=SUB)
    err2 = float(jnp.max(jnp.abs(out2 - ref2)))
    assert err2 < 0.25, f"max |diff| (sub=2) = {err2}"

    # easy_margin branch sanity check (same kernel, different static flag).
    out3 = jax.jit(functools.partial(arc_margin_product, easy_margin=True))(
        x, label, weight)
    jax.block_until_ready(out3)
    ref3 = arc_margin_reference(x, label, weight, easy_margin=True)
    err3 = float(jnp.max(jnp.abs(out3 - ref3)))
    assert err3 < 0.25, f"max |diff| (easy_margin) = {err3}"

    print("KERNEL_OK")
</pallas_src>

<mosaic_0001>
module attributes {stable_mosaic.version = 11 : i64} {
  func.func @_arc_margin_kernel(%arg0: i32, %arg1: i32, %arg2: memref<8x128xf32, #tpu.memory_space<vmem>>, %arg3: memref<1x256x128xbf16, #tpu.memory_space<vmem>>, %arg4: memref<8x1xi32, #tpu.memory_space<vmem>>, %arg5: memref<8x256xf32, #tpu.memory_space<vmem>>, %arg6: memref<8x128xbf16, #tpu.memory_space<vmem>>) attributes {dimension_semantics = [#tpu.dimension_semantics<parallel>, #tpu.dimension_semantics<arbitrary>], iteration_bounds = array<i64: 1, 1>, scalar_prefetch = 0 : i64, scratch_operands = 1 : i64, tpu.core_type = #tpu.core_type<tc>, window_params = [{transform_indices = @transform_0, window_bounds = array<i64: 8, 128>}, {transform_indices = @transform_1, window_bounds = array<i64: 1, 256, 128>}, {transform_indices = @transform_2, window_bounds = array<i64: 8, 1>}, {transform_indices = @transform_3, window_bounds = array<i64: 8, 256>}]} {
    %c0_i32 = arith.constant 0 : i32
    %0 = arith.cmpi eq, %arg1, %c0_i32 : i32
    %1 = arith.extui %0 : i1 to i32
    %c0_i32_0 = arith.constant 0 : i32
    %2 = arith.cmpi ne, %1, %c0_i32_0 : i32
    scf.if %2 {
      %c0_17 = arith.constant 0 : index
      %c0_18 = arith.constant 0 : index
      %36 = vector.load %arg2[%c0_17, %c0_18] : memref<8x128xf32, #tpu.memory_space<vmem>>, vector<8x128xf32>
      %37 = arith.mulf %36, %36 : vector<8x128xf32>
      %cst_19 = arith.constant dense<0.000000e+00> : vector<8xf32>
      %38 = vector.multi_reduction <add>, %37, %cst_19 [1] : vector<8x128xf32> to vector<8xf32>
      %39 = vector.shape_cast %38 : vector<8xf32> to vector<8x1xf32>
      %cst_20 = arith.constant 1.000000e-24 : f32
      %40 = vector.broadcast %cst_20 : f32 to vector<8x1xf32>
      %41 = arith.maximumf %39, %40 : vector<8x1xf32>
      %42 = math.rsqrt %41 : vector<8x1xf32>
      %43 = vector.broadcast %42 : vector<8x1xf32> to vector<8x128xf32>
      %44 = arith.mulf %36, %43 : vector<8x128xf32>
      %45 = arith.truncf %44 : vector<8x128xf32> to vector<8x128xbf16>
      %c0_21 = arith.constant 0 : index
      %c0_22 = arith.constant 0 : index
      %46 = vector.load %arg6[%c0_21, %c0_22] : memref<8x128xbf16, #tpu.memory_space<vmem>>, vector<8x128xbf16>
      tpu.vector_store %arg6[%c0_21, %c0_22], %45 {strides = array<i32>} : memref<8x128xbf16, #tpu.memory_space<vmem>>, vector<8x128xbf16>,
    } else {
    }
    %c0 = arith.constant 0 : index
    %c0_1 = arith.constant 0 : index
    %3 = vector.load %arg6[%c0, %c0_1] : memref<8x128xbf16, #tpu.memory_space<vmem>>, vector<8x128xbf16>
    %c0_2 = arith.constant 0 : index
    %c0_3 = arith.constant 0 : index
    %c0_4 = arith.constant 0 : index
    %4 = vector.load %arg3[%c0_2, %c0_3, %c0_4] : memref<1x256x128xbf16, #tpu.memory_space<vmem>>, vector<1x256x128xbf16>
    %5 = vector.shape_cast %4 : vector<1x256x128xbf16> to vector<256x128xbf16>
    %cst = arith.constant dense<0.000000e+00> : vector<8x256xf32>
    %6 = tpu.matmul %3, %5, %cst {dimension_numbers = #tpu.dot_dimension_numbers<[1], [1], [0], [0], [0, 0, 1, 0], [], []>} : vector<8x128xbf16>, vector<256x128xbf16>, vector<8x256xf32> -> vector<8x256xf32>
    %7 = arith.mulf %6, %6 : vector<8x256xf32>
    %cst_5 = arith.constant 1.000000e+00 : f32
    %8 = vector.broadcast %cst_5 : f32 to vector<8x256xf32>
    %9 = arith.subf %8, %7 : vector<8x256xf32>
    %cst_6 = arith.constant 0.000000e+00 : f32
    %10 = vector.broadcast %cst_6 : f32 to vector<8x256xf32>
    %11 = arith.maximumf %9, %10 : vector<8x256xf32>
    %12 = math.sqrt %11 : vector<8x256xf32>
    %cst_7 = arith.constant 3.200000e+01 : f32
    %13 = vector.broadcast %cst_7 : f32 to vector<8x256xf32>
    %14 = arith.mulf %6, %13 : vector<8x256xf32>
    %cst_8 = arith.constant 28.0826416 : f32
    %15 = vector.broadcast %cst_8 : f32 to vector<8x256xf32>
    %16 = arith.mulf %6, %15 : vector<8x256xf32>
    %cst_9 = arith.constant 15.3416176 : f32
    %17 = vector.broadcast %cst_9 : f32 to vector<8x256xf32>
    %18 = arith.mulf %12, %17 : vector<8x256xf32>
    %19 = arith.subf %16, %18 : vector<8x256xf32>
    %cst_10 = arith.constant -0.87758255 : f32
    %20 = vector.broadcast %cst_10 : f32 to vector<8x256xf32>
    %21 = arith.subf %6, %20 : vector<8x256xf32>
    %cst_11 = arith.constant 0.000000e+00 : f32
    %22 = vector.broadcast %cst_11 : f32 to vector<8x256xf32>
    %23 = arith.cmpf ogt, %21, %22 : vector<8x256xf32>
    %cst_12 = arith.constant 7.67080879 : f32
    %24 = vector.broadcast %cst_12 : f32 to vector<8x256xf32>
    %25 = arith.subf %14, %24 : vector<8x256xf32>
    %26 = arith.select %23, %19, %25 : vector<8x256xi1>, vector<8x256xf32>
    %27 = tpu.iota {dimensions = array<i32: 1>} : vector<8x256xi32>
    %c0_13 = arith.constant 0 : index
    %c0_14 = arith.constant 0 : index
    %28 = vector.load %arg4[%c0_13, %c0_14] : memref<8x1xi32, #tpu.memory_space<vmem>>, vector<8x1xi32>
    %c256_i32 = arith.constant 256 : i32
    %29 = arith.muli %arg1, %c256_i32 : i32
    %30 = vector.broadcast %29 : i32 to vector<8x1xi32>
    %31 = arith.subi %28, %30 : vector<8x1xi32>
    %32 = vector.broadcast %31 : vector<8x1xi32> to vector<8x256xi32>
    %33 = arith.cmpi eq, %27, %32 : vector<8x256xi32>
    %34 = arith.select %33, %26, %14 : vector<8x256xi1>, vector<8x256xf32>
    %c0_15 = arith.constant 0 : index
    %c0_16 = arith.constant 0 : index
    %35 = vector.load %arg5[%c0_15, %c0_16] : memref<8x256xf32, #tpu.memory_space<vmem>>, vector<8x256xf32>
    tpu.vector_store %arg5[%c0_15, %c0_16], %34 {strides = array<i32>} : memref<8x256xf32, #tpu.memory_space<vmem>>, vector<8x256xf32>,
    return
  }
  func.func @transform_0(%arg0: i32, %arg1: i32) -> (i32, i32) {
    %c0_i32 = arith.constant 0 : i32
    %c0_i32_0 = arith.constant 0 : i32
    return %arg0, %c0_i32 : i32, i32
  }
  func.func @transform_1(%arg0: i32, %arg1: i32) -> (i32, i32, i32) {
    %c0_i32 = arith.constant 0 : i32
    %c0_i32_0 = arith.constant 0 : i32
    %c0_i32_1 = arith.constant 0 : i32
    return %c0_i32, %arg1, %c0_i32_0 : i32, i32, i32
  }
  func.func @transform_2(%arg0: i32, %arg1: i32) -> (i32, i32) {
    %c0_i32 = arith.constant 0 : i32
    %c0_i32_0 = arith.constant 0 : i32
    return %arg0, %c0_i32 : i32, i32
  }
  func.func @transform_3(%arg0: i32, %arg1: i32) -> (i32, i32) {
    %c0_i32 = arith.constant 0 : i32
    return %arg0, %arg1 : i32, i32
  }
}

</mosaic_0001>

<bundles_post_ra>
// kernel: arc_margin_product_packed.1
= control target key start
LH: loop header
LB: loop body
LE: loop exit
PB: predicated region body
PF: predicated region fallthrough
CT: control target
= control target key end

     0   :  { %8 = vsyncpa [#allocation4], 0  ;;  %s395_s15 = smov [#allocation3]   ;;  %s396_s17 = smov 64   ;;  %s434_s0 = inlined_call_operand.vmem [shape: f32[8,128], index: 0, kind: input, shape index: {}]   ;;  %s435_s1 = inlined_call_operand.hbm [shape: bf16[1,256,128], index: 1, kind: input, shape index: {}]   ;;  %s436_s2 = inlined_call_operand.vmem [shape: s32[8,1], index: 2, kind: input, shape index: {}]   ;;  %s437_s3 = inlined_call_operand.vmem [shape: f32[8,256], index: 3, kind: output, shape index: {}]  }
   0x1   :  { %s15_s14 = sshll.u32 %s435_s1, 4  ;;  %s17_s16 = sshll.u32 %s395_s15, 4  ;;  %s16_s14 = int_to_ptr.hbm [resolvable:$true] %s15_s14  ;;  %s18_s16 = int_to_ptr.vmem [resolvable:$true] %s17_s16 }
   0x2   :  { %s397_s18 = smov 4  }
   0x3   :  { %23 = dma.hbm_to_vmem [thread:$0]  %s16_s14, 2048, %s18_s16, [#allocation4], %s396_s17, %s396_s17, %s397_s18  }
   0x4   :  { %393 = dma.done.wait [#allocation4], 2048  }
   0x5   :  { %394 = vsyncadd [#allocation4], 4294965248  ;;  %v34_v0 = vld [vmem:[%s434_s0] sm:$0xff]  ;;  %v348_v4 = vld [vmem:[#allocation3 + $0x30] sm:$0xff]  ;;  %v398_v21 = vmov 0   ;;  %v253_v47 = vlaneseq }
   0x6   :  { %v349_v1 = vld [vmem:[#allocation3 + $0x38] sm:$0xff]  ;;  %v35_v3 = vmul.f32 %v34_v0, %v34_v0  ;;  %v356_v5 = vld [vmem:[#allocation3 + $0x70] sm:$0xff]  ;;  %v347_v6 = vld [vmem:[#allocation3 + $0x28] sm:$0xff]  ;;  %362 = vset.pattern.permute.xlu0 %v398_v21 }
   0x7   :  { %v357_v2 = vld [vmem:[#allocation3 + $0x78] sm:$0xff]  ;;  %181 = vmatpush.bf16.xpose.msra.mxu0 %v349_v1  ;;  %v355_v7 = vld [vmem:[#allocation3 + $0x68] sm:$0xff]  ;;  %v346_v8 = vld [vmem:[#allocation3 + $0x20] sm:$0xff]  ;;  %v254_v52 = vand.u32 127, %v253_v47 }
   0x8   :  { %194 = vmatpush.bf16.xpose.msra.mxu1 %v357_v2  ;;  %36 = vadd.xlane.f32.xlu0 %v35_v3  ;;  %v354_v9 = vld [vmem:[#allocation3 + $0x60] sm:$0xff]  ;;  %v345_v10 = vld [vmem:[#allocation3 + $0x18] sm:$0xff]  ;;  %v344_v12 = vld [vmem:[#allocation3 + $0x10] sm:$0xff] }
   0x9   :  { %v353_v11 = vld [vmem:[#allocation3 + $0x58] sm:$0xff]  ;;  %v352_v13 = vld [vmem:[#allocation3 + $0x50] sm:$0xff]  ;;  %v343_v14 = vld [vmem:[#allocation3 + $0x8] sm:$0xff]  ;;  %v255_v58 = vadd.s32 128, %v254_v52 }
   0xa   :  { %v351_v15 = vld [vmem:[#allocation3 + $0x48] sm:$0xff]  ;;  %v342_v16 = vld [vmem:[#allocation3] sm:$0xff] }
   0xb   :  { %v350_v17 = vld [vmem:[#allocation3 + $0x40] sm:$0xff] }
   0xc   :  { %v256_v20 = vld [vmem:[%s436_s2] sm:$0xff] }
   0xf   :  { %182 = vmatpush.bf16.xpose.msra.mxu0 %v348_v4 }
  0x10   :  { %195 = vmatpush.bf16.xpose.msra.mxu1 %v356_v5 }
  0x17   :  { %183 = vmatpush.bf16.xpose.msra.mxu0 %v347_v6 }
  0x18   :  { %196 = vmatpush.bf16.xpose.msra.mxu1 %v355_v7 }
  0x1c   :  { %261 = vperm.xlu0 %362, %v256_v20  }
  0x1f   :  { %184 = vmatpush.bf16.xpose.msra.mxu0 %v346_v8 }
  0x20   :  { %197 = vmatpush.bf16.xpose.msra.mxu1 %v354_v9 }
  0x27   :  { %185 = vmatpush.bf16.xpose.msra.mxu0 %v345_v10 }
  0x28   :  { %198 = vmatpush.bf16.xpose.msra.mxu1 %v353_v11 }
  0x2f   :  { %186 = vmatpush.bf16.xpose.msra.mxu0 %v344_v12 }
  0x30   :  { %199 = vmatpush.bf16.xpose.msra.mxu1 %v352_v13 }
  0x37   :  { %187 = vmatpush.bf16.xpose.msra.mxu0 %v343_v14 }
  0x38   :  { %200 = vmatpush.bf16.xpose.msra.mxu1 %v351_v15 }
  0x3f   :  { %188 = vmatpush.bf16.xpose.msra.mxu0 %v342_v16 }
  0x40   :  { %201 = vmatpush.bf16.xpose.msra.mxu1 %v350_v17 }
  0x7b   :  { %v37_v18 = vpop.xlane.xlu0 %36 }
  0x7c   :  { %v38_v19 = vmax.f32 %v37_v18, 1e-24 }
  0x7e   :  { %363 = vrsqrt.f32 %v38_v19  ;;  %vm45_vm1 = vweird.f32 %v38_v19 }
  0x84   :  { %v364_v22 = vpop.eup %363 }
  0x85   :  { %v40_v23 = vmul.f32 %v364_v22, %v38_v19  ;;  %vm46_vm0 = vweird.f32 %v364_v22 }
  0x86   :  { %vm47_vm2 = vmor %vm45_vm1, %vm46_vm0 }
  0x87   :  { %v41_v24 = vmul.f32 %v364_v22, %v40_v23 }
  0x89   :  { %v42_v25 = vmul.f32 0.5, %v41_v24 }
  0x8b   :  { %v43_v26 = vsub.f32 1.5, %v42_v25 }
  0x8d   :  { %v44_v27 = vmul.f32 %v364_v22, %v43_v26 }
  0x8e   :  { %v262_v3 = vpop.permute.xlu0 %261 }
  0x8f   :  { %v48_v28 = vsel %vm47_vm2, %v364_v22, %v44_v27  ;;  %vm263_vm7 = vcmp.eq.s32.totalorder %v254_v52, %v262_v3  ;;  %vm264_vm9 = vcmp.eq.s32.totalorder %v255_v58, %v262_v3 }
  0x90   :  { %v49_v29 = vmul.f32 %v48_v28, %v34_v0 }
  0x92   :  { %v50_v30 = vpack.c.bf16 %v49_v29, %v49_v29 }
  0x94   :  { %51 = vst [vmem:[#allocation2] sm:$0xf] %v50_v30 }
  0x9b   :  { %v52_v31 = vld [vmem:[#allocation2] sm:$0xf] }
  0x9c   :  { %189 = vmatmul.bf16.vlgmr.msra.gmra.mxu0 %v52_v31  ;;  %202 = vmatmul.bf16.vlgmr.msra.gmra.mxu1 %v52_v31 }
 0x119   :  { %v190_v32 = vpop.f32.mrf.mxu0  ;;  %v203_v33 = vpop.f32.mrf.mxu1 }
 0x11a   :  { %v207_v34 = vmul.f32 %v190_v32, %v190_v32  ;;  %v208_v35 = vmul.f32 %v203_v33, %v203_v33  ;;  %v237_v57 = vmul.f32 32.0, %v190_v32  ;;  %v338_v60 = vadd.f32 0.87758255, %v190_v32 }
 0x11b   :  { %v238_v2 = vmul.f32 32.0, %v203_v33  ;;  %v239_v4 = vmul.f32 28.082642, %v190_v32  ;;  %v339_v7 = vadd.f32 0.87758255, %v203_v33 }
 0x11c   :  { %v209_v36 = vsub.f32 1.0, %v207_v34  ;;  %v210_v37 = vsub.f32 1.0, %v208_v35  ;;  %v240_v8 = vmul.f32 28.082642, %v203_v33  ;;  %v340_v11 = vadd.f32 -7.670809, %v237_v57 }
 0x11d   :  { %vm247_vm8 = vcmp.gt.f32.partialorder %v338_v60, 0.0  ;;  %v341_v13 = vadd.f32 -7.670809, %v238_v2  ;;  %vm248_vm10 = vcmp.gt.f32.partialorder %v339_v7, 0.0 }
 0x11e   :  { %v211_v38 = vmax.f32 %v209_v36, 0.0  ;;  %v212_v39 = vmax.f32 %v210_v37, 0.0 }
 0x120   :  { %365 = vrsqrt.f32 %v211_v38  ;;  %vm220_vm3 = vcmp.eq.f32.partialorder %v211_v38, inf  ;;  %v223_v59 = vand.u32 2147483648, %v211_v38  ;;  %vm222_vm4 = vcmp.eq.f32.partialorder %v211_v38, 0.0 }
 0x121   :  { %367 = vrsqrt.f32 %v212_v39  ;;  %v192_v40 = vpop.f32.mrf.mxu0  ;;  %v205_v41 = vpop.f32.mrf.mxu1  ;;  %vm232_vm5 = vcmp.eq.f32.partialorder %v212_v39, inf  ;;  %v235_v63 = vand.u32 2147483648, %v212_v39  ;;  %vm234_vm6 = vcmp.eq.f32.partialorder %v212_v39, 0.0 }
 0x126   :  { %v366_v42 = vpop.eup %365 }
 0x127   :  { %v368_v43 = vpop.eup %367  ;;  %v214_v44 = vmul.f32 %v366_v42, %v211_v38 }
 0x128   :  { %v226_v45 = vmul.f32 %v368_v43, %v212_v39 }
 0x129   :  { %v215_v46 = vmul.f32 %v366_v42, %v214_v44 }
 0x12a   :  { %v227_v48 = vmul.f32 %v368_v43, %v226_v45 }
 0x12b   :  { %v216_v49 = vmul.f32 0.5, %v215_v46 }
 0x12c   :  { %v228_v50 = vmul.f32 0.5, %v227_v48 }
 0x12d   :  { %v217_v51 = vsub.f32 1.5, %v216_v49 }
 0x12e   :  { %v229_v53 = vsub.f32 1.5, %v228_v50 }
 0x12f   :  { %v218_v54 = vmul.f32 %v366_v42, %v217_v51 }
 0x130   :  { %v230_v55 = vmul.f32 %v368_v43, %v229_v53 }
 0x131   :  { %v219_v56 = vmul.f32 %v218_v54, %v211_v38 }
 0x132   :  { %v231_v61 = vmul.f32 %v230_v55, %v212_v39 }
 0x133   :  { %v221_v62 = vsel %vm220_vm3, %v211_v38, %v219_v56 }
 0x134   :  { %v224_v0 = vsel %vm222_vm4, %v223_v59, %v221_v62  ;;  %v233_v1 = vsel %vm232_vm5, %v212_v39, %v231_v61 }
 0x135   :  { %v241_v5 = vmul.f32 15.341618, %v224_v0  ;;  %v236_v6 = vsel %vm234_vm6, %v235_v63, %v233_v1 }
 0x136   :  { %v242_v9 = vmul.f32 15.341618, %v236_v6 }
 0x137   :  { %v243_v10 = vsub.f32 %v239_v4, %v241_v5 }
 0x138   :  { %v244_v12 = vsub.f32 %v240_v8, %v242_v9 }
 0x139   :  { %v251_v14 = vsel %vm247_vm8, %v243_v10, %v340_v11 }
 0x13a   :  { %v252_v15 = vsel %vm248_vm10, %v244_v12, %v341_v13  ;;  %v265_v16 = vsel %vm263_vm7, %v251_v14, %v237_v57 }
 0x13b   :  { %v266_v17 = vsel %vm264_vm9, %v252_v15, %v238_v2  ;;  %267 = vst [vmem:[%s437_s3] sm:$0xff] %v265_v16 }
 0x13c   :  { %268 = vst [vmem:[%s437_s3 + $0x8] sm:$0xff] %v266_v17 }
 0x13d   :  { %273 = vsyncpa [#allocation4], 1 }

</bundles_post_ra>
